<compile_context>
chip_gen: v5e
topology: v5e:2x2
jax: 0.10.0
libtpu: 0.0.40
codegen_flags: <defaults>
</compile_context>

<pallas_src>
import functools

import jax
import jax.numpy as jnp
from jax import lax
from jax.experimental import pallas as pl
from jax.experimental.pallas import tpu as pltpu


NC_LANE = 128          # one full lane width for per-sample loss / padded class dim
NEG_BIG = -1.0e30      # "minus infinity" for padded class columns


def _cls_xent_kernel(x_ref, w_ref, b_ref, lbl_ref, logits_ref, loss_ref, acc_ref):
    """Fused tiled linear head + softmax cross-entropy.

    grid = (batch_tiles, k_tiles); k is the reduction axis (innermost).

    x_ref:      [TB, TK]    bf16 flattened-image tile
    w_ref:      [TK, NCP]   bf16 weight tile (NCP = classes padded to 128; pad cols = 0)
    b_ref:      [1,  NCP]   f32 bias (padded cols = -1e30)
    lbl_ref:    [TB, 1]     int32 labels (padded rows are -1)
    logits_ref: [TB, NCP]   f32 logits output
    loss_ref:   [TB, 128]   f32 per-sample loss (broadcast across lanes)
    acc_ref:    [TB, NCP]   f32 VMEM accumulator scratch
    """
    k = pl.program_id(1)

    @pl.when(k == 0)
    def _init():
        acc_ref[...] = jnp.zeros_like(acc_ref)

    # bf16 x bf16 -> f32 on the MXU, accumulated in f32 VMEM scratch.
    acc_ref[...] += jnp.dot(x_ref[...], w_ref[...],
                            preferred_element_type=jnp.float32)

    @pl.when(k == pl.num_programs(1) - 1)
    def _epilogue():
        # Padded columns: weights are 0 -> acc = 0; bias = -1e30 -> logits ~ -1e30,
        # so they vanish from max / log-sum-exp with no extra masking ops.
        logits = acc_ref[...] + b_ref[...]                       # [TB, NCP] f32
        logits_ref[...] = logits.astype(logits_ref.dtype)

        tb, ncp = logits.shape

        # numerically-stable log-sum-exp (padded cols contribute exp(-huge) = 0)
        m = jnp.max(logits, axis=-1, keepdims=True)              # [TB, 1]
        lse = m + jnp.log(jnp.sum(jnp.exp(logits - m), axis=-1,
                                  keepdims=True))                # [TB, 1]

        # picked logit via iota == label (no materialized one-hot input)
        col = lax.broadcasted_iota(jnp.int32, (tb, ncp), 1)
        onehot = col == lbl_ref[...]                             # [TB, NCP] bool
        picked = jnp.sum(jnp.where(onehot, logits, 0.0), axis=-1,
                         keepdims=True)                          # [TB, 1]

        per_sample = lse - picked                                # [TB, 1]
        # lane-dense (unmasked) store; wrapper reads column 0
        loss_ref[...] = jnp.broadcast_to(per_sample, loss_ref.shape)


def _round_up(v, m):
    return pl.cdiv(v, m) * m


@functools.partial(jax.jit, static_argnames=("num_classes",))
def _run_task_kernel(x_flat, weight, bias, labels, *, num_classes):
    B, D = x_flat.shape
    NC = num_classes
    NCP = _round_up(NC, NC_LANE)

    # Adaptive, VMEM-friendly tile sizes.
    TB = min(128, _round_up(B, 8))        # batch tile (sublane multiple of 8)
    TK = min(1024, _round_up(D, 128))     # reduction tile (lane multiple of 128)

    B_pad = _round_up(B, TB)
    D_pad = _round_up(D, TK)

    # Pad + cast matmul inputs to bf16 (zeros contribute nothing to the dot).
    x_p = jnp.zeros((B_pad, D_pad), jnp.bfloat16).at[:B, :D].set(
        x_flat.astype(jnp.bfloat16))
    w_p = jnp.zeros((D_pad, NCP), jnp.bfloat16).at[:D, :NC].set(
        weight.astype(jnp.bfloat16))
    # Padded bias columns = -1e30 so they drop out of softmax with no in-kernel mask.
    b_p = jnp.full((1, NCP), NEG_BIG, jnp.float32).at[:, :NC].set(
        bias.reshape(1, NC).astype(jnp.float32))
    lbl_p = jnp.full((B_pad, 1), -1, jnp.int32).at[:B, 0].set(
        labels.astype(jnp.int32))

    n_b = B_pad // TB
    n_k = D_pad // TK

    logits_p, per_sample = pl.pallas_call(
        _cls_xent_kernel,
        out_shape=(
            jax.ShapeDtypeStruct((B_pad, NCP), jnp.float32),
            jax.ShapeDtypeStruct((B_pad, NC_LANE), jnp.float32),
        ),
        grid_spec=pltpu.PrefetchScalarGridSpec(
            num_scalar_prefetch=0,
            grid=(n_b, n_k),
            in_specs=[
                pl.BlockSpec((TB, TK), lambda i, k: (i, k)),      # x tile
                pl.BlockSpec((TK, NCP), lambda i, k: (k, 0)),     # w tile
                pl.BlockSpec((1, NCP), lambda i, k: (0, 0)),      # bias (resident)
                pl.BlockSpec((TB, 1), lambda i, k: (i, 0)),       # labels
            ],
            out_specs=[
                pl.BlockSpec((TB, NCP), lambda i, k: (i, 0)),     # logits
                pl.BlockSpec((TB, NC_LANE), lambda i, k: (i, 0)), # per-sample loss
            ],
            scratch_shapes=[pltpu.VMEM((TB, NCP), jnp.float32)],
        ),
        compiler_params=pltpu.CompilerParams(
            dimension_semantics=("parallel", "arbitrary"),
        ),
    )(x_p, w_p, b_p, lbl_p)

    logits = logits_p[:B, :NC]
    # mean over the *true* batch rows (padded rows excluded by slicing)
    class_loss = jnp.sum(per_sample[:B, 0]) / jnp.float32(B)
    return logits, class_loss


def image_classification_forward(params, batch, num_classes):
    """Semantics of ImageClassification.forward with wiring_cost=None.

    batch: {'image': [B, C, H, W] float, 'label': [B] int}
    Returns (loss, state) just like the PyTorch module.
    """
    images = batch["image"]
    target = batch["label"]
    B = images.shape[0]

    # flatten NCHW row-major (matches torch .reshape(B, -1) inside the model)
    x_flat = images.reshape(B, -1)

    output, class_loss = _run_task_kernel(
        x_flat, params["weight"], params["bias"], target,
        num_classes=num_classes)

    # wiring_cost is None -> wiring_loss = zeros_like(class_loss)
    wiring_loss = jnp.zeros_like(class_loss)
    loss = class_loss + wiring_loss

    state = {
        "image": images,
        "label": target,
        "output": output,
        "class_loss": class_loss,
        "wiring_loss": wiring_loss,
    }
    return loss, state


if __name__ == "__main__":
    # small shapes consistent with the module's forward
    B, C, H, W = 2, 4, 16, 16
    NUM_CLASSES = 16  # synthetic classifier head size
    D = C * H * W

    key = jax.random.PRNGKey(0)
    k_img, k_lbl, k_w, k_b = jax.random.split(key, 4)

    batch = {
        "image": jax.random.normal(k_img, (B, C, H, W), dtype=jnp.float32),
        "label": jax.random.randint(k_lbl, (B,), 0, NUM_CLASSES, dtype=jnp.int32),
    }
    # deterministic synthetic "model" parameters (linear classifier head)
    params = {
        "weight": jax.random.normal(k_w, (D, NUM_CLASSES), dtype=jnp.float32) * 0.02,
        "bias": (jax.random.normal(k_b, (NUM_CLASSES,), dtype=jnp.float32)
                 .reshape(1, NUM_CLASSES) * 0.02),
    }

    loss, state = image_classification_forward(params, batch, NUM_CLASSES)
    jax.block_until_ready(loss)

    # sanity check against a pure-JAX reference using the same bf16 matmul path
    xb = batch["image"].reshape(B, -1).astype(jnp.bfloat16)
    wb = params["weight"].astype(jnp.bfloat16)
    logits_ref = jnp.dot(xb, wb, preferred_element_type=jnp.float32) \
        + params["bias"].astype(jnp.float32)
    lse = jax.nn.logsumexp(logits_ref, axis=-1)
    picked = jnp.take_along_axis(logits_ref, batch["label"][:, None], axis=-1)[:, 0]
    ref_loss = jnp.mean(lse - picked)

    assert jnp.allclose(loss, ref_loss, atol=1e-4, rtol=1e-4), (loss, ref_loss)
    assert jnp.allclose(state["output"], logits_ref, atol=1e-4, rtol=1e-4)
    assert bool(state["wiring_loss"] == 0.0)

    # TODO(synk): WiringCost(state['attns']) branch not implemented (wiring_cost is None in this config).
    print("KERNEL_OK")
</pallas_src>

<mosaic_0001>
module attributes {stable_mosaic.version = 11 : i64} {
  func.func @_cls_xent_kernel(%arg0: i32, %arg1: i32, %arg2: memref<8x1024xbf16, #tpu.memory_space<vmem>>, %arg3: memref<1024x128xbf16, #tpu.memory_space<vmem>>, %arg4: memref<1x128xf32, #tpu.memory_space<vmem>>, %arg5: memref<8x1xi32, #tpu.memory_space<vmem>>, %arg6: memref<8x128xf32, #tpu.memory_space<vmem>>, %arg7: memref<8x128xf32, #tpu.memory_space<vmem>>, %arg8: memref<8x128xf32, #tpu.memory_space<vmem>>) attributes {dimension_semantics = [#tpu.dimension_semantics<parallel>, #tpu.dimension_semantics<arbitrary>], iteration_bounds = array<i64: 1, 1>, scalar_prefetch = 0 : i64, scratch_operands = 1 : i64, tpu.core_type = #tpu.core_type<tc>, window_params = [{transform_indices = @transform_0, window_bounds = array<i64: 8, 1024>}, {transform_indices = @transform_1, window_bounds = array<i64: 1024, 128>}, {pipeline_mode = #tpu.pipeline_mode<synchronous>, transform_indices = @transform_2, window_bounds = array<i64: 1, 128>}, {transform_indices = @transform_3, window_bounds = array<i64: 8, 1>}, {transform_indices = @transform_4, window_bounds = array<i64: 8, 128>}, {transform_indices = @transform_5, window_bounds = array<i64: 8, 128>}]} {
    %c0_i32 = arith.constant 0 : i32
    %0 = arith.cmpi eq, %arg1, %c0_i32 : i32
    %1 = arith.extui %0 : i1 to i32
    %c0_i32_0 = arith.constant 0 : i32
    %2 = arith.cmpi ne, %1, %c0_i32_0 : i32
    scf.if %2 {
      %cst_10 = arith.constant 0.000000e+00 : f32
      %12 = vector.broadcast %cst_10 : f32 to vector<8x128xf32>
      %c0_11 = arith.constant 0 : index
      %c0_12 = arith.constant 0 : index
      %13 = vector.load %arg8[%c0_11, %c0_12] : memref<8x128xf32, #tpu.memory_space<vmem>>, vector<8x128xf32>
      tpu.vector_store %arg8[%c0_11, %c0_12], %12 {strides = array<i32>} : memref<8x128xf32, #tpu.memory_space<vmem>>, vector<8x128xf32>,
    } else {
    }
    %c0 = arith.constant 0 : index
    %c0_1 = arith.constant 0 : index
    %3 = vector.load %arg8[%c0, %c0_1] : memref<8x128xf32, #tpu.memory_space<vmem>>, vector<8x128xf32>
    %c0_2 = arith.constant 0 : index
    %c0_3 = arith.constant 0 : index
    %4 = vector.load %arg2[%c0_2, %c0_3] : memref<8x1024xbf16, #tpu.memory_space<vmem>>, vector<8x1024xbf16>
    %c0_4 = arith.constant 0 : index
    %c0_5 = arith.constant 0 : index
    %5 = vector.load %arg3[%c0_4, %c0_5] : memref<1024x128xbf16, #tpu.memory_space<vmem>>, vector<1024x128xbf16>
    %cst = arith.constant dense<0.000000e+00> : vector<8x128xf32>
    %6 = tpu.matmul %4, %5, %cst {dimension_numbers = #tpu.dot_dimension_numbers<[1], [0], [0], [1], [0, 0, 1, 1], [], []>} : vector<8x1024xbf16>, vector<1024x128xbf16>, vector<8x128xf32> -> vector<8x128xf32>
    %7 = arith.addf %3, %6 : vector<8x128xf32>
    %c0_6 = arith.constant 0 : index
    %c0_7 = arith.constant 0 : index
    %8 = vector.load %arg8[%c0_6, %c0_7] : memref<8x128xf32, #tpu.memory_space<vmem>>, vector<8x128xf32>
    tpu.vector_store %arg8[%c0_6, %c0_7], %7 {strides = array<i32>} : memref<8x128xf32, #tpu.memory_space<vmem>>, vector<8x128xf32>,
    %c0_i32_8 = arith.constant 0 : i32
    %9 = arith.cmpi eq, %arg1, %c0_i32_8 : i32
    %10 = arith.extui %9 : i1 to i32
    %c0_i32_9 = arith.constant 0 : i32
    %11 = arith.cmpi ne, %10, %c0_i32_9 : i32
    scf.if %11 {
      %c0_10 = arith.constant 0 : index
      %c0_11 = arith.constant 0 : index
      %12 = vector.load %arg8[%c0_10, %c0_11] : memref<8x128xf32, #tpu.memory_space<vmem>>, vector<8x128xf32>
      %c0_12 = arith.constant 0 : index
      %c0_13 = arith.constant 0 : index
      %13 = vector.load %arg4[%c0_12, %c0_13] : memref<1x128xf32, #tpu.memory_space<vmem>>, vector<1x128xf32>
      %14 = vector.broadcast %13 : vector<1x128xf32> to vector<8x128xf32>
      %15 = arith.addf %12, %14 : vector<8x128xf32>
      %c0_14 = arith.constant 0 : index
      %c0_15 = arith.constant 0 : index
      %16 = vector.load %arg6[%c0_14, %c0_15] : memref<8x128xf32, #tpu.memory_space<vmem>>, vector<8x128xf32>
      tpu.vector_store %arg6[%c0_14, %c0_15], %15 {strides = array<i32>} : memref<8x128xf32, #tpu.memory_space<vmem>>, vector<8x128xf32>,
      %cst_16 = arith.constant dense<0xFF800000> : vector<8xf32>
      %17 = vector.multi_reduction <maximumf>, %15, %cst_16 [1] : vector<8x128xf32> to vector<8xf32>
      %18 = vector.shape_cast %17 : vector<8xf32> to vector<8x1xf32>
      %19 = vector.broadcast %18 : vector<8x1xf32> to vector<8x128xf32>
      %20 = arith.subf %15, %19 : vector<8x128xf32>
      %21 = math.exp %20 : vector<8x128xf32>
      %cst_17 = arith.constant dense<0.000000e+00> : vector<8xf32>
      %22 = vector.multi_reduction <add>, %21, %cst_17 [1] : vector<8x128xf32> to vector<8xf32>
      %23 = vector.shape_cast %22 : vector<8xf32> to vector<8x1xf32>
      %24 = math.log %23 : vector<8x1xf32>
      %25 = arith.addf %18, %24 : vector<8x1xf32>
      %26 = tpu.iota {dimensions = array<i32: 1>} : vector<8x128xi32>
      %c0_18 = arith.constant 0 : index
      %c0_19 = arith.constant 0 : index
      %27 = vector.load %arg5[%c0_18, %c0_19] : memref<8x1xi32, #tpu.memory_space<vmem>>, vector<8x1xi32>
      %28 = vector.broadcast %27 : vector<8x1xi32> to vector<8x128xi32>
      %29 = arith.cmpi eq, %26, %28 : vector<8x128xi32>
      %cst_20 = arith.constant 0.000000e+00 : f32
      %30 = vector.broadcast %cst_20 : f32 to vector<8x128xf32>
      %31 = arith.select %29, %15, %30 : vector<8x128xi1>, vector<8x128xf32>
      %cst_21 = arith.constant dense<0.000000e+00> : vector<8xf32>
      %32 = vector.multi_reduction <add>, %31, %cst_21 [1] : vector<8x128xf32> to vector<8xf32>
      %33 = vector.shape_cast %32 : vector<8xf32> to vector<8x1xf32>
      %34 = arith.subf %25, %33 : vector<8x1xf32>
      %35 = vector.shape_cast %34 : vector<8x1xf32> to vector<8x1xf32>
      %36 = vector.broadcast %35 : vector<8x1xf32> to vector<8x128xf32>
      %c0_22 = arith.constant 0 : index
      %c0_23 = arith.constant 0 : index
      %37 = vector.load %arg7[%c0_22, %c0_23] : memref<8x128xf32, #tpu.memory_space<vmem>>, vector<8x128xf32>
      tpu.vector_store %arg7[%c0_22, %c0_23], %36 {strides = array<i32>} : memref<8x128xf32, #tpu.memory_space<vmem>>, vector<8x128xf32>,
    } else {
    }
    return
  }
  func.func @transform_0(%arg0: i32, %arg1: i32) -> (i32, i32) {
    %c0_i32 = arith.constant 0 : i32
    return %arg0, %arg1 : i32, i32
  }
  func.func @transform_1(%arg0: i32, %arg1: i32) -> (i32, i32) {
    %c0_i32 = arith.constant 0 : i32
    %c0_i32_0 = arith.constant 0 : i32
    return %arg1, %c0_i32 : i32, i32
  }
  func.func @transform_2(%arg0: i32, %arg1: i32) -> (i32, i32) {
    %c0_i32 = arith.constant 0 : i32
    %c0_i32_0 = arith.constant 0 : i32
    %c0_i32_1 = arith.constant 0 : i32
    return %c0_i32, %c0_i32_0 : i32, i32
  }
  func.func @transform_3(%arg0: i32, %arg1: i32) -> (i32, i32) {
    %c0_i32 = arith.constant 0 : i32
    %c0_i32_0 = arith.constant 0 : i32
    return %arg0, %c0_i32 : i32, i32
  }
  func.func @transform_4(%arg0: i32, %arg1: i32) -> (i32, i32) {
    %c0_i32 = arith.constant 0 : i32
    %c0_i32_0 = arith.constant 0 : i32
    return %arg0, %c0_i32 : i32, i32
  }
  func.func @transform_5(%arg0: i32, %arg1: i32) -> (i32, i32) {
    %c0_i32 = arith.constant 0 : i32
    %c0_i32_0 = arith.constant 0 : i32
    return %arg0, %c0_i32 : i32, i32
  }
}

</mosaic_0001>

<bundles_post_ra>
// kernel: _run_task_kernel.1
= control target key start
LH: loop header
LB: loop body
LE: loop exit
PB: predicated region body
PF: predicated region fallthrough
CT: control target
= control target key end

     0   :  { %s1289_s1 = inlined_call_operand.vmem [shape: bf16[1024,128], index: 1, kind: input, shape index: {}]   ;;  %s1290_s0 = inlined_call_operand.vmem [shape: bf16[8,1024], index: 0, kind: input, shape index: {}]   ;;  %s1291_s2 = inlined_call_operand.vmem [shape: f32[1,128], index: 2, kind: input, shape index: {}]   ;;  %s1292_s4 = inlined_call_operand.vmem [shape: f32[8,128], index: 4, kind: output, shape index: {0}]   ;;  %s1293_s3 = inlined_call_operand.vmem [shape: s32[8,1], index: 3, kind: input, shape index: {}]   ;;  %s1294_s5 = inlined_call_operand.vmem [shape: f32[8,128], index: 5, kind: output, shape index: {1}]  }
   0x1   :  { %v978_v0 = vld [vmem:[%s1289_s1 + $0x38] sm:$0xff]  ;;  %v977_v4 = vld [vmem:[%s1289_s1 + $0x30] sm:$0xff]  ;;  %v976_v8 = vld [vmem:[%s1289_s1 + $0x28] sm:$0xff] }
   0x2   :  { %v986_v1 = vld [vmem:[%s1289_s1 + $0x78] sm:$0xff]  ;;  %569 = vmatpush.bf16.msra.mxu0 %v978_v0  ;;  %v985_v5 = vld [vmem:[%s1289_s1 + $0x70] sm:$0xff]  ;;  %v984_v9 = vld [vmem:[%s1289_s1 + $0x68] sm:$0xff] }
   0x3   :  { %v994_v2 = vld [vmem:[%s1289_s1 + $0xb8] sm:$0xff]  ;;  %582 = vmatpush.bf16.msra.mxu1 %v986_v1  ;;  %v993_v6 = vld [vmem:[%s1289_s1 + $0xb0] sm:$0xff]  ;;  %v992_v10 = vld [vmem:[%s1289_s1 + $0xa8] sm:$0xff] }
   0x4   :  { %v1002_v3 = vld [vmem:[%s1289_s1 + $0xf8] sm:$0xff]  ;;  %595 = vmatpush.bf16.msra.mxu2 %v994_v2  ;;  %v1001_v7 = vld [vmem:[%s1289_s1 + $0xf0] sm:$0xff]  ;;  %v1000_v11 = vld [vmem:[%s1289_s1 + $0xe8] sm:$0xff] }
   0x5   :  { %608 = vmatpush.bf16.msra.mxu3 %v1002_v3  ;;  %v975_v12 = vld [vmem:[%s1289_s1 + $0x20] sm:$0xff]  ;;  %v974_v16 = vld [vmem:[%s1289_s1 + $0x18] sm:$0xff]  ;;  %v973_v20 = vld [vmem:[%s1289_s1 + $0x10] sm:$0xff] }
   0x6   :  { %570 = vmatpush.bf16.msra.mxu0 %v977_v4  ;;  %v983_v13 = vld [vmem:[%s1289_s1 + $0x60] sm:$0xff]  ;;  %v982_v17 = vld [vmem:[%s1289_s1 + $0x58] sm:$0xff]  ;;  %v981_v21 = vld [vmem:[%s1289_s1 + $0x50] sm:$0xff] }
   0x7   :  { %583 = vmatpush.bf16.msra.mxu1 %v985_v5  ;;  %v991_v14 = vld [vmem:[%s1289_s1 + $0xa0] sm:$0xff]  ;;  %v990_v18 = vld [vmem:[%s1289_s1 + $0x98] sm:$0xff]  ;;  %v989_v22 = vld [vmem:[%s1289_s1 + $0x90] sm:$0xff] }
   0x8   :  { %596 = vmatpush.bf16.msra.mxu2 %v993_v6  ;;  %v999_v15 = vld [vmem:[%s1289_s1 + $0xe0] sm:$0xff]  ;;  %v998_v19 = vld [vmem:[%s1289_s1 + $0xd8] sm:$0xff]  ;;  %v997_v23 = vld [vmem:[%s1289_s1 + $0xd0] sm:$0xff] }
   0x9   :  { %609 = vmatpush.bf16.msra.mxu3 %v1001_v7  ;;  %v972_v24 = vld [vmem:[%s1289_s1 + $0x8] sm:$0xff]  ;;  %v25_v29 = vld [vmem:[%s1290_s0] sm:$0xff]  ;;  %v1010_v38 = vld [vmem:[%s1289_s1 + $0x138] sm:$0xff] }
   0xa   :  { %571 = vmatpush.bf16.msra.mxu0 %v976_v8  ;;  %v980_v25 = vld [vmem:[%s1289_s1 + $0x48] sm:$0xff]  ;;  %v971_v30 = vld [vmem:[%s1289_s1] sm:$0xff]  ;;  %v161_v33 = vunpack.c.l.b16 %v25_v29  ;;  %v162_v37 = vunpack.c.h.b16 %v25_v29  ;;  %v1018_v39 = vld [vmem:[%s1289_s1 + $0x178] sm:$0xff] }
   0xb   :  { %584 = vmatpush.bf16.msra.mxu1 %v984_v9  ;;  %v988_v26 = vld [vmem:[%s1289_s1 + $0x88] sm:$0xff]  ;;  %v979_v31 = vld [vmem:[%s1289_s1 + $0x40] sm:$0xff]  ;;  %v1026_v40 = vld [vmem:[%s1289_s1 + $0x1b8] sm:$0xff] }
   0xc   :  { %597 = vmatpush.bf16.msra.mxu2 %v992_v10  ;;  %v996_v27 = vld [vmem:[%s1289_s1 + $0xc8] sm:$0xff]  ;;  %v987_v34 = vld [vmem:[%s1289_s1 + $0x80] sm:$0xff]  ;;  %v1034_v41 = vld [vmem:[%s1289_s1 + $0x1f8] sm:$0xff]  ;;  %v169_v43 = vpack.c.b16 %v161_v33, %v161_v33  ;;  %v170_v45 = vpack.c.b16 %v162_v37, %v162_v37 }
   0xd   :  { %610 = vmatpush.bf16.msra.mxu3 %v1000_v11  ;;  %v26_v28 = vld [vmem:[%s1290_s0 + $0x8] sm:$0xff]  ;;  %v995_v35 = vld [vmem:[%s1289_s1 + $0xc0] sm:$0xff]  ;;  %v1009_v46 = vld [vmem:[%s1289_s1 + $0x130] sm:$0xff] }
   0xe   :  { %572 = vmatpush.bf16.msra.mxu0 %v975_v12  ;;  %v163_v32 = vunpack.c.l.b16 %v26_v28  ;;  %v164_v36 = vunpack.c.h.b16 %v26_v28  ;;  %v1017_v47 = vld [vmem:[%s1289_s1 + $0x170] sm:$0xff]  ;;  %v1008_v50 = vld [vmem:[%s1289_s1 + $0x128] sm:$0xff]  ;;  %v1007_v54 = vld [vmem:[%s1289_s1 + $0x120] sm:$0xff] }
   0xf   :  { %585 = vmatpush.bf16.msra.mxu1 %v983_v13  ;;  %v1025_v48 = vld [vmem:[%s1289_s1 + $0x1b0] sm:$0xff]  ;;  %v1016_v51 = vld [vmem:[%s1289_s1 + $0x168] sm:$0xff]  ;;  %v1015_v55 = vld [vmem:[%s1289_s1 + $0x160] sm:$0xff] }
  0x10   :  { %598 = vmatpush.bf16.msra.mxu2 %v991_v14  ;;  %v171_v42 = vpack.c.b16 %v163_v32, %v163_v32  ;;  %v172_v44 = vpack.c.b16 %v164_v36, %v164_v36  ;;  %v1033_v49 = vld [vmem:[%s1289_s1 + $0x1f0] sm:$0xff]  ;;  %v1024_v52 = vld [vmem:[%s1289_s1 + $0x1a8] sm:$0xff]  ;;  %v1023_v56 = vld [vmem:[%s1289_s1 + $0x1a0] sm:$0xff] }
  0x11   :  { %611 = vmatpush.bf16.msra.mxu3 %v999_v15  ;;  %v1032_v53 = vld [vmem:[%s1289_s1 + $0x1e8] sm:$0xff]  ;;  %v1031_v57 = vld [vmem:[%s1289_s1 + $0x1e0] sm:$0xff]  ;;  %v1006_v58 = vld [vmem:[%s1289_s1 + $0x118] sm:$0xff] }
  0x12   :  { %573 = vmatpush.bf16.msra.mxu0 %v974_v16  ;;  %v1014_v59 = vld [vmem:[%s1289_s1 + $0x158] sm:$0xff]  ;;  %v1005_v62 = vld [vmem:[%s1289_s1 + $0x110] sm:$0xff]  ;;  %v1004_v2 = vld [vmem:[%s1289_s1 + $0x108] sm:$0xff] }
  0x13   :  { %586 = vmatpush.bf16.msra.mxu1 %v982_v17  ;;  %v1022_v60 = vld [vmem:[%s1289_s1 + $0x198] sm:$0xff]  ;;  %v1013_v63 = vld [vmem:[%s1289_s1 + $0x150] sm:$0xff]  ;;  %v1012_v3 = vld [vmem:[%s1289_s1 + $0x148] sm:$0xff] }
  0x14   :  { %599 = vmatpush.bf16.msra.mxu2 %v990_v18  ;;  %v1030_v61 = vld [vmem:[%s1289_s1 + $0x1d8] sm:$0xff]  ;;  %v1021_v0 = vld [vmem:[%s1289_s1 + $0x190] sm:$0xff]  ;;  %v1020_v5 = vld [vmem:[%s1289_s1 + $0x188] sm:$0xff] }
  0x15   :  { %612 = vmatpush.bf16.msra.mxu3 %v998_v19  ;;  %v1029_v1 = vld [vmem:[%s1289_s1 + $0x1d0] sm:$0xff]  ;;  %v1028_v6 = vld [vmem:[%s1289_s1 + $0x1c8] sm:$0xff]  ;;  %v28_v7 = vld [vmem:[%s1290_s0 + $0x18] sm:$0xff] }
  0x16   :  { %574 = vmatpush.bf16.msra.mxu0 %v973_v20  ;;  %v27_v4 = vld [vmem:[%s1290_s0 + $0x10] sm:$0xff]  ;;  %v1003_v10 = vld [vmem:[%s1289_s1 + $0x100] sm:$0xff]  ;;  %v167_v12 = vunpack.c.l.b16 %v28_v7  ;;  %v168_v13 = vunpack.c.h.b16 %v28_v7 }
  0x17   :  { %587 = vmatpush.bf16.msra.mxu1 %v981_v21  ;;  %v165_v8 = vunpack.c.l.b16 %v27_v4  ;;  %v166_v9 = vunpack.c.h.b16 %v27_v4  ;;  %v1011_v11 = vld [vmem:[%s1289_s1 + $0x140] sm:$0xff] }
  0x18   :  { %600 = vmatpush.bf16.msra.mxu2 %v989_v22  ;;  %v1019_v14 = vld [vmem:[%s1289_s1 + $0x180] sm:$0xff]  ;;  %v175_v18 = vpack.c.b16 %v167_v12, %v167_v12  ;;  %v176_v19 = vpack.c.b16 %v168_v13, %v168_v13 }
  0x19   :  { %613 = vmatpush.bf16.msra.mxu3 %v997_v23  ;;  %v1027_v15 = vld [vmem:[%s1289_s1 + $0x1c0] sm:$0xff]  ;;  %v173_v16 = vpack.c.b16 %v165_v8, %v165_v8  ;;  %v174_v17 = vpack.c.b16 %v166_v9, %v166_v9 }
  0x1a   :  { %575 = vmatpush.bf16.msra.mxu0 %v972_v24 }
  0x1b   :  { %588 = vmatpush.bf16.msra.mxu1 %v980_v25 }
  0x1c   :  { %601 = vmatpush.bf16.msra.mxu2 %v988_v26  ;;  %v1042_v26 = vmov 0  }
  0x1d   :  { %614 = vmatpush.bf16.msra.mxu3 %v996_v27  ;;  %1036 = vset.pattern.permute.xlu0 %v1042_v26 }
  0x1e   :  { %576 = vmatpush.bf16.msra.mxu0 %v971_v30 }
  0x1f   :  { %589 = vmatpush.bf16.msra.mxu1 %v979_v31 }
  0x20   :  { %602 = vmatpush.bf16.msra.mxu2 %v987_v34 }
  0x21   :  { %615 = vmatpush.bf16.msra.mxu3 %v995_v35  ;;  %577 = vmatmul.bf16.vlgmr.msra.gmra.mxu0 %v169_v43 }
  0x22   :  { %621 = vmatpush.bf16.msrb.mxu0 %v1010_v38  ;;  %590 = vmatmul.bf16.vlgmr.msra.gmra.mxu1 %v170_v45 }
  0x23   :  { %634 = vmatpush.bf16.msrb.mxu1 %v1018_v39  ;;  %603 = vmatmul.bf16.vlgmr.msra.gmra.mxu2 %v171_v42  ;;  %v1037_v39 = vld [vmem:[%s1291_s2] ss:$0 sm:$0xff] }
  0x24   :  { %647 = vmatpush.bf16.msrb.mxu2 %v1026_v40  ;;  %616 = vmatmul.bf16.vlgmr.msra.gmra.mxu3 %v172_v44 }
  0x25   :  { %660 = vmatpush.bf16.msrb.mxu3 %v1034_v41 }
  0x26   :  { %622 = vmatpush.bf16.msrb.mxu0 %v1009_v46  ;;  %v697_v46 = vld [vmem:[%s1293_s3] sm:$0xff] }
  0x27   :  { %635 = vmatpush.bf16.msrb.mxu1 %v1017_v47 }
  0x28   :  { %648 = vmatpush.bf16.msrb.mxu2 %v1025_v48 }
  0x29   :  { %661 = vmatpush.bf16.msrb.mxu3 %v1033_v49 }
  0x2a   :  { %623 = vmatpush.bf16.msrb.mxu0 %v1008_v50 }
  0x2b   :  { %636 = vmatpush.bf16.msrb.mxu1 %v1016_v51  ;;  %v695_v51 = vlaneseq }
  0x2c   :  { %649 = vmatpush.bf16.msrb.mxu2 %v1024_v52 }
  0x2d   :  { %662 = vmatpush.bf16.msrb.mxu3 %v1032_v53  ;;  %v696_v52 = vand.u32 127, %v695_v51 }
  0x2e   :  { %624 = vmatpush.bf16.msrb.mxu0 %v1007_v54 }
  0x2f   :  { %637 = vmatpush.bf16.msrb.mxu1 %v1015_v55 }
  0x30   :  { %650 = vmatpush.bf16.msrb.mxu2 %v1023_v56 }
  0x31   :  { %663 = vmatpush.bf16.msrb.mxu3 %v1031_v57 }
  0x32   :  { %625 = vmatpush.bf16.msrb.mxu0 %v1006_v58 }
  0x33   :  { %638 = vmatpush.bf16.msrb.mxu1 %v1014_v59 }
  0x34   :  { %651 = vmatpush.bf16.msrb.mxu2 %v1022_v60 }
  0x35   :  { %664 = vmatpush.bf16.msrb.mxu3 %v1030_v61 }
  0x36   :  { %626 = vmatpush.bf16.msrb.mxu0 %v1005_v62 }
  0x37   :  { %639 = vmatpush.bf16.msrb.mxu1 %v1013_v63 }
  0x38   :  { %652 = vmatpush.bf16.msrb.mxu2 %v1021_v0 }
  0x39   :  { %665 = vmatpush.bf16.msrb.mxu3 %v1029_v1 }
  0x3a   :  { %627 = vmatpush.bf16.msrb.mxu0 %v1004_v2 }
  0x3b   :  { %640 = vmatpush.bf16.msrb.mxu1 %v1012_v3 }
  0x3c   :  { %653 = vmatpush.bf16.msrb.mxu2 %v1020_v5 }
  0x3d   :  { %666 = vmatpush.bf16.msrb.mxu3 %v1028_v6 }
  0x3e   :  { %628 = vmatpush.bf16.msrb.mxu0 %v1003_v10 }
  0x3f   :  { %641 = vmatpush.bf16.msrb.mxu1 %v1011_v11 }
  0x40   :  { %654 = vmatpush.bf16.msrb.mxu2 %v1019_v14 }
  0x41   :  { %667 = vmatpush.bf16.msrb.mxu3 %v1027_v15  ;;  %629 = vmatmul.bf16.vlgmr.msrb.gmra.mxu0 %v173_v16 }
  0x42   :  { %642 = vmatmul.bf16.vlgmr.msrb.gmra.mxu1 %v174_v17 }
  0x43   :  { %655 = vmatmul.bf16.vlgmr.msrb.gmra.mxu2 %v175_v18 }
  0x44   :  { %668 = vmatmul.bf16.vlgmr.msrb.gmra.mxu3 %v176_v19 }
  0x9e   :  { %v578_v20 = vpop.f32.mrf.mxu0 }
  0x9f   :  { %v591_v21 = vpop.f32.mrf.mxu1 }
  0xa0   :  { %v592_v29 = vadd.f32 %v591_v21, %v578_v20 }
  0xa6   :  { %v604_v22 = vpop.f32.mrf.mxu2  ;;  %v580_v24 = vpop.f32.mrf.mxu0 }
  0xa7   :  { %v617_v23 = vpop.f32.mrf.mxu3  ;;  %v593_v25 = vpop.f32.mrf.mxu1  ;;  %v605_v30 = vadd.f32 %v604_v22, %v592_v29 }
  0xa9   :  { %v618_v31 = vadd.f32 %v617_v23, %v605_v30 }
  0xae   :  { %v606_v27 = vpop.f32.mrf.mxu2 }
  0xaf   :  { %v619_v28 = vpop.f32.mrf.mxu3 }
  0xbe   :  { %v630_v32 = vpop.f32.mrf.mxu0 }
  0xbf   :  { %v643_v33 = vpop.f32.mrf.mxu1  ;;  %v631_v34 = vadd.f32 %v630_v32, %v618_v31 }
  0xc1   :  { %v644_v35 = vadd.f32 %v643_v33, %v631_v34 }
  0xc6   :  { %v656_v36 = vpop.f32.mrf.mxu2  ;;  %v632_v40 = vpop.f32.mrf.mxu0 }
  0xc7   :  { %v669_v37 = vpop.f32.mrf.mxu3  ;;  %v657_v38 = vadd.f32 %v656_v36, %v644_v35  ;;  %v645_v41 = vpop.f32.mrf.mxu1 }
  0xc9   :  { %v670_v42 = vadd.f32 %v669_v37, %v657_v38 }
  0xcb   :  { %v683_v43 = vadd.f32 %v1037_v39, %v670_v42 }
  0xcd   :  { %684 = vst [vmem:[%s1292_s4] sm:$0xff] %v683_v43  ;;  %685 = vmax.xlane.f32.xlu0 %v683_v43 }
  0xce   :  { %v658_v44 = vpop.f32.mrf.mxu2 }
  0xcf   :  { %v671_v45 = vpop.f32.mrf.mxu3 }
  0xe1   :  { %699 = vperm.xlu0 %1036, %v697_v46  }
 0x140   :  { %v686_v47 = vpop.xlane.xlu0 %685 }
 0x141   :  { %v687_v48 = vsub.f32 %v683_v43, %v686_v47 }
 0x143   :  { %v688_v49 = vmul.f32 1.442695, %v687_v48 }
 0x145   :  { %1038 = vpow2.f32 %v688_v49 }
 0x14b   :  { %v1039_v50 = vpop.eup %1038 }
 0x14c   :  { %690 = vadd.xlane.f32.xlu1 %v1039_v50 }
 0x153   :  { %v700_v53 = vpop.permute.xlu0 %699 }
 0x154   :  { %vm701_vm0 = vcmp.eq.s32.totalorder %v696_v52, %v700_v53 }
 0x155   :  { %v702_v54 = vsel %vm701_vm0, %v683_v43, 0.0 }
 0x156   :  { %703 = vadd.xlane.f32.xlu1 %v702_v54 }
 0x1bf   :  { %v691_v55 = vpop.xlane.xlu1 %690 }
 0x1c0   :  { %1040 = vlog2.f32 %v691_v55 }
 0x1c6   :  { %v1041_v56 = vpop.eup %1040 }
 0x1c7   :  { %v693_v57 = vmul.f32 0.6931472, %v1041_v56 }
 0x1c9   :  { %v694_v58 = vadd.f32 %v693_v57, %v686_v47  ;;  %v704_v59 = vpop.xlane.xlu1 %703 }
 0x1cb   :  { %v705_v60 = vsub.f32 %v694_v58, %v704_v59 }
 0x1cd   :  { %706 = vst [vmem:[%s1294_s5] sm:$0xff] %v705_v60 }

</bundles_post_ra>
